<compile_context>
chip_gen: v6e
topology: v6e:2x2x1
jax: 0.10.0
libtpu: 0.0.40
codegen_flags: <defaults>
</compile_context>

<pallas_src>
import jax
import jax.numpy as jnp
from jax.experimental import pallas as pl
from jax.experimental.pallas import tpu as pltpu

_C, _H, _W = 10, 4, 8            # Net_d input geometry (NCHW = N, 10, 4, 8)
_KA = _C * _H                    # 40: conv1 patch width  (col = ci*4 + kh)
_KB = _C * _W                    # 80: conv2 patch width  (col = ci*8 + kw)
_B1_COL = _KA                    # 40: "ones" column for conv1 bias fold
_B2_COL = _KB                    # 80: "ones" column for conv2 bias fold
_KPAD = 128                      # padded shared K for both conv matmuls
_N1 = 128                        # conv1 matmul out width (real 0:80)
_N2 = 256                        # conv2 matmul out width (real 0:160)
_FC_K = 4 * _N1 + 2 * _N2        # 1024: pcat width (4 conv1 groups + 2 conv2 groups)
_FC_N = 128                      # fc output padded 4 -> 128 (lane-dense store)


def _round_up(v, m):
    return -(-v // m) * m


def _net_d_kernel(xab_ref, wc1_ref, wc2_ref, wfc_ref, bfc_ref, out_ref, pcat_ref):
    """One batch tile: per-group conv matmul -> fused relu/maxpool -> bf16 pcat
    slab -> single lane-dense fc matmul."""
    f32 = jnp.float32
    cdt = pcat_ref.dtype

    # conv1 pooled groups r=0..3: pool partners are rows (r, r+6); relu folded
    # into the max (monotonic).  Only the 128-lane conv1 block is kept.
    for r in range(4):
        ya = jnp.dot(xab_ref[r], wc1_ref[...], preferred_element_type=f32)      # (tb,128)
        yb = jnp.dot(xab_ref[r + 6], wc1_ref[...], preferred_element_type=f32)
        pcat_ref[:, r * _N1:(r + 1) * _N1] = (
            jnp.maximum(jnp.maximum(ya, yb), 0.0).astype(cdt))

    # conv2 pooled groups r=0..1: pool partners are rows (4+r, 10+r).
    for r in range(2):
        ya = jnp.dot(xab_ref[4 + r], wc2_ref[...], preferred_element_type=f32)   # (tb,256)
        yb = jnp.dot(xab_ref[10 + r], wc2_ref[...], preferred_element_type=f32)
        off = 4 * _N1 + r * _N2
        pcat_ref[:, off:off + _N2] = (
            jnp.maximum(jnp.maximum(ya, yb), 0.0).astype(cdt))

    # one fc matmul, lane-dense 128-wide output (unmasked stores).
    out_ref[...] = (jnp.dot(pcat_ref[...], wfc_ref[...], preferred_element_type=f32)
                    + bfc_ref[...])


def prepare_net_d_params(params, compute_dtype=jnp.bfloat16):
    """One-time weight re-layout (hoisted out of the per-call forward path)."""
    W1, b1 = params["w1"], params["b1"]          # (80,10,4,1), (80,)
    W2, b2 = params["w2"], params["b2"]          # (160,10,1,8), (160,)
    Wf, bf = params["wf"], params["bf"]          # (4,640), (4,)

    # conv1 weight slab (128,128): rows 0:40 weights, row 40 = bias (ones col).
    w1m = W1.reshape(80, _KA).T.astype(jnp.float32)          # (40, 80)  [ci*4+kh, co]
    wc1 = jnp.zeros((_KPAD, _N1), jnp.float32)
    wc1 = wc1.at[0:_KA, 0:80].set(w1m)
    wc1 = wc1.at[_B1_COL, 0:80].set(b1.astype(jnp.float32))

    # conv2 weight slab (128,256): rows 0:80 weights, row 80 = bias (ones col).
    w2m = W2.reshape(160, _KB).T.astype(jnp.float32)         # (80, 160) [ci*8+kw, co]
    wc2 = jnp.zeros((_KPAD, _N2), jnp.float32)
    wc2 = wc2.at[0:_KB, 0:160].set(w2m)
    wc2 = wc2.at[_B2_COL, 0:160].set(b2.astype(jnp.float32))

    # fc weight permuted into pcat order, lane-dense (1024, 128).
    #   conv1 group j (j=0..3): pcat lane j*128 + c  <->  flat x1 index c*4 + j
    #   conv2 group h (h=0..1): pcat lane 512 + h*256 + c <-> flat 320 + c*2 + h
    wfT = Wf.T.astype(jnp.float32)                           # (640, 4)
    wfc = jnp.zeros((_FC_K, _FC_N), jnp.float32)
    for j in range(4):
        wfc = wfc.at[j * _N1: j * _N1 + 80, 0:4].set(wfT[j:320:4])
    for h in range(2):
        off = 4 * _N1 + h * _N2
        wfc = wfc.at[off: off + 160, 0:4].set(wfT[320 + h:640:2])

    bfc = jnp.zeros((1, _FC_N), jnp.float32).at[0, 0:4].set(bf.astype(jnp.float32))

    return {"wc1": wc1.astype(compute_dtype),
            "wc2": wc2.astype(compute_dtype),
            "wfc": wfc.astype(compute_dtype),
            "bfc": bfc}                                      # fc bias stays f32


def net_d_forward(x, prepped, *, batch_tile=512):
    n, c, h, w = x.shape
    assert (c, h, w) == (_C, _H, _W), "Net_d requires NCHW input (N, 10, 4, 8)"
    wc1, wc2, wfc, bfc = prepped["wc1"], prepped["wc2"], prepped["wfc"], prepped["bfc"]
    compute_dtype = wc1.dtype

    # ---- batch tile selection: big tiles, but >=2 grid steps when possible
    # (keeps both v7x TensorCores busy; free on v5e/v6e). -----------------------
    n8 = _round_up(max(n, 1), 8)
    if n8 <= 8:
        tb = 8
    else:
        tb = min(batch_tile, _round_up(-(-n8 // 2), 8))
    n_pad = _round_up(n8, tb)

    # ---- per-call glue: im2col into pool-partner-ordered bf16 patch rows ------
    xa = jnp.transpose(x, (3, 0, 1, 2)).reshape(_W, n, _KA).astype(compute_dtype)  # (8,N,40)
    xb = jnp.transpose(x, (2, 0, 1, 3)).reshape(_H, n, _KB).astype(compute_dtype)  # (4,N,80)

    # rows 0..3: conv1 w=0,2,4,6 ; rows 4..5: conv2 h=0,2   (first pool partners)
    # rows 6..9: conv1 w=1,3,5,7 ; rows 10..11: conv2 h=1,3 (second pool partners)
    # conv1 rows: patch in cols 0:40, bias "one" at col 40
    # conv2 rows: patch in cols 0:80, bias "one" at col 80
    xab = jnp.zeros((12, n_pad, _KPAD), compute_dtype)
    xab = xab.at[0:4, :n, 0:_KA].set(xa[0::2])
    xab = xab.at[6:10, :n, 0:_KA].set(xa[1::2])
    xab = xab.at[4:6, :n, 0:_KB].set(xb[0::2])
    xab = xab.at[10:12, :n, 0:_KB].set(xb[1::2])
    xab = xab.at[0:4, :n, _B1_COL].set(1.0)
    xab = xab.at[6:10, :n, _B1_COL].set(1.0)
    xab = xab.at[4:6, :n, _B2_COL].set(1.0)
    xab = xab.at[10:12, :n, _B2_COL].set(1.0)

    out = pl.pallas_call(
        _net_d_kernel,
        out_shape=jax.ShapeDtypeStruct((n_pad, _FC_N), jnp.float32),
        grid=(n_pad // tb,),
        in_specs=[
            pl.BlockSpec((12, tb, _KPAD), lambda i: (0, i, 0)),     # batch-tiled patches
            pl.BlockSpec((_KPAD, _N1), lambda i: (0, 0)),           # resident conv1 weights
            pl.BlockSpec((_KPAD, _N2), lambda i: (0, 0)),           # resident conv2 weights
            pl.BlockSpec((_FC_K, _FC_N), lambda i: (0, 0)),         # resident fc weights
            pl.BlockSpec((1, _FC_N), lambda i: (0, 0)),             # fc bias
        ],
        out_specs=pl.BlockSpec((tb, _FC_N), lambda i: (i, 0)),
        scratch_shapes=[pltpu.VMEM((tb, _FC_K), compute_dtype)],    # bf16 pcat slab
        compiler_params=pltpu.CompilerParams(
            dimension_semantics=("parallel",),
            vmem_limit_bytes=40 * 1024 * 1024,
        ),
    )(xab, wc1, wc2, wfc, bfc)
    return out[:n, 0:4]


def net_d_reference(x, params):
    """Plain-JAX f32 reference matching the PyTorch forward exactly."""
    n = x.shape[0]
    W1, b1 = params["w1"], params["b1"]
    W2, b2 = params["w2"], params["b2"]
    Wf, bf = params["wf"], params["bf"]
    c1 = jnp.einsum('nihw,oih->now', x, W1[..., 0]) + b1[None, :, None]      # (N,80,8)
    c1 = jnp.maximum(c1, 0.0)
    x1 = c1.reshape(n, 80, 4, 2).max(axis=-1).reshape(n, 320)
    c2 = jnp.einsum('nihw,oiw->noh', x, W2[:, :, 0, :]) + b2[None, :, None]  # (N,160,4)
    c2 = jnp.maximum(c2, 0.0)
    x2 = c2.reshape(n, 160, 2, 2).max(axis=-1).reshape(n, 320)
    xc = jnp.concatenate([x1, x2], axis=1)
    return xc @ Wf.T + bf[None, :]


if __name__ == "__main__":
    key = jax.random.PRNGKey(0)
    ks = jax.random.split(key, 7)
    params = {
        "w1": 0.05 * jax.random.normal(ks[0], (80, 10, 4, 1), jnp.float32),
        "b1": 0.05 * jax.random.normal(ks[1], (80,), jnp.float32),
        "w2": 0.05 * jax.random.normal(ks[2], (160, 10, 1, 8), jnp.float32),
        "b2": 0.05 * jax.random.normal(ks[3], (160,), jnp.float32),
        "wf": 0.05 * jax.random.normal(ks[4], (4, 640), jnp.float32),
        "bf": 0.05 * jax.random.normal(ks[5], (4,), jnp.float32),
    }
    # batch=2; Net_d's 640-feature flatten implies spatial (H, W) = (4, 8), channels=10.
    x = jax.random.normal(ks[6], (2, 10, 4, 8), jnp.float32)

    prepped = prepare_net_d_params(params)           # one-time weight prep
    fwd = jax.jit(net_d_forward)
    out = jax.block_until_ready(fwd(x, prepped))
    ref = net_d_reference(x, params)
    assert out.shape == (2, 4)
    # bf16 MXU compute vs f32 reference -> loosened tolerance (observed err ~1e-3).
    if not bool(jnp.allclose(out, ref, atol=2.5e-2, rtol=2.5e-2)):
        raise AssertionError(f"mismatch: kernel={out}, ref={ref}")
    print("KERNEL_OK")
</pallas_src>

<mosaic_0001>
module attributes {stable_mosaic.version = 11 : i64} {
  func.func @_net_d_kernel(%arg0: i32, %arg1: memref<12x8x128xbf16, #tpu.memory_space<vmem>>, %arg2: memref<128x128xbf16, #tpu.memory_space<vmem>>, %arg3: memref<128x256xbf16, #tpu.memory_space<vmem>>, %arg4: memref<1024x128xbf16, #tpu.memory_space<vmem>>, %arg5: memref<1x128xf32, #tpu.memory_space<vmem>>, %arg6: memref<8x128xf32, #tpu.memory_space<vmem>>, %arg7: memref<8x1024xbf16, #tpu.memory_space<vmem>>) attributes {dimension_semantics = [#tpu.dimension_semantics<parallel>], iteration_bounds = array<i64: 1>, scalar_prefetch = 0 : i64, scratch_operands = 1 : i64, tpu.core_type = #tpu.core_type<tc>, window_params = [{transform_indices = @transform_0, window_bounds = array<i64: 12, 8, 128>}, {pipeline_mode = #tpu.pipeline_mode<synchronous>, transform_indices = @transform_1, window_bounds = array<i64: 128, 128>}, {pipeline_mode = #tpu.pipeline_mode<synchronous>, transform_indices = @transform_2, window_bounds = array<i64: 128, 256>}, {pipeline_mode = #tpu.pipeline_mode<synchronous>, transform_indices = @transform_3, window_bounds = array<i64: 1024, 128>}, {pipeline_mode = #tpu.pipeline_mode<synchronous>, transform_indices = @transform_4, window_bounds = array<i64: 1, 128>}, {transform_indices = @transform_5, window_bounds = array<i64: 8, 128>}]} {
    %c0 = arith.constant 0 : index
    %c0_0 = arith.constant 0 : index
    %c0_1 = arith.constant 0 : index
    %0 = vector.load %arg1[%c0, %c0_0, %c0_1] : memref<12x8x128xbf16, #tpu.memory_space<vmem>>, vector<1x8x128xbf16>
    %1 = vector.shape_cast %0 : vector<1x8x128xbf16> to vector<8x128xbf16>
    %c0_2 = arith.constant 0 : index
    %c0_3 = arith.constant 0 : index
    %2 = vector.load %arg2[%c0_2, %c0_3] : memref<128x128xbf16, #tpu.memory_space<vmem>>, vector<128x128xbf16>
    %cst = arith.constant dense<0.000000e+00> : vector<8x128xf32>
    %3 = tpu.matmul %1, %2, %cst {dimension_numbers = #tpu.dot_dimension_numbers<[1], [0], [0], [1], [0, 0, 1, 1], [], []>} : vector<8x128xbf16>, vector<128x128xbf16>, vector<8x128xf32> -> vector<8x128xf32>
    %c6 = arith.constant 6 : index
    %c0_4 = arith.constant 0 : index
    %c0_5 = arith.constant 0 : index
    %4 = vector.load %arg1[%c6, %c0_4, %c0_5] : memref<12x8x128xbf16, #tpu.memory_space<vmem>>, vector<1x8x128xbf16>
    %5 = vector.shape_cast %4 : vector<1x8x128xbf16> to vector<8x128xbf16>
    %c0_6 = arith.constant 0 : index
    %c0_7 = arith.constant 0 : index
    %6 = vector.load %arg2[%c0_6, %c0_7] : memref<128x128xbf16, #tpu.memory_space<vmem>>, vector<128x128xbf16>
    %cst_8 = arith.constant dense<0.000000e+00> : vector<8x128xf32>
    %7 = tpu.matmul %5, %6, %cst_8 {dimension_numbers = #tpu.dot_dimension_numbers<[1], [0], [0], [1], [0, 0, 1, 1], [], []>} : vector<8x128xbf16>, vector<128x128xbf16>, vector<8x128xf32> -> vector<8x128xf32>
    %8 = arith.maximumf %3, %7 : vector<8x128xf32>
    %cst_9 = arith.constant 0.000000e+00 : f32
    %9 = vector.broadcast %cst_9 : f32 to vector<8x128xf32>
    %10 = arith.maximumf %8, %9 : vector<8x128xf32>
    %11 = arith.truncf %10 : vector<8x128xf32> to vector<8x128xbf16>
    %c0_10 = arith.constant 0 : index
    %c0_11 = arith.constant 0 : index
    %12 = vector.load %arg7[%c0_10, %c0_11] : memref<8x1024xbf16, #tpu.memory_space<vmem>>, vector<8x128xbf16>
    tpu.vector_store %arg7[%c0_10, %c0_11], %11 {strides = array<i32>} : memref<8x1024xbf16, #tpu.memory_space<vmem>>, vector<8x128xbf16>,
    %c1 = arith.constant 1 : index
    %c0_12 = arith.constant 0 : index
    %c0_13 = arith.constant 0 : index
    %13 = vector.load %arg1[%c1, %c0_12, %c0_13] : memref<12x8x128xbf16, #tpu.memory_space<vmem>>, vector<1x8x128xbf16>
    %14 = vector.shape_cast %13 : vector<1x8x128xbf16> to vector<8x128xbf16>
    %c0_14 = arith.constant 0 : index
    %c0_15 = arith.constant 0 : index
    %15 = vector.load %arg2[%c0_14, %c0_15] : memref<128x128xbf16, #tpu.memory_space<vmem>>, vector<128x128xbf16>
    %cst_16 = arith.constant dense<0.000000e+00> : vector<8x128xf32>
    %16 = tpu.matmul %14, %15, %cst_16 {dimension_numbers = #tpu.dot_dimension_numbers<[1], [0], [0], [1], [0, 0, 1, 1], [], []>} : vector<8x128xbf16>, vector<128x128xbf16>, vector<8x128xf32> -> vector<8x128xf32>
    %c7 = arith.constant 7 : index
    %c0_17 = arith.constant 0 : index
    %c0_18 = arith.constant 0 : index
    %17 = vector.load %arg1[%c7, %c0_17, %c0_18] : memref<12x8x128xbf16, #tpu.memory_space<vmem>>, vector<1x8x128xbf16>
    %18 = vector.shape_cast %17 : vector<1x8x128xbf16> to vector<8x128xbf16>
    %c0_19 = arith.constant 0 : index
    %c0_20 = arith.constant 0 : index
    %19 = vector.load %arg2[%c0_19, %c0_20] : memref<128x128xbf16, #tpu.memory_space<vmem>>, vector<128x128xbf16>
    %cst_21 = arith.constant dense<0.000000e+00> : vector<8x128xf32>
    %20 = tpu.matmul %18, %19, %cst_21 {dimension_numbers = #tpu.dot_dimension_numbers<[1], [0], [0], [1], [0, 0, 1, 1], [], []>} : vector<8x128xbf16>, vector<128x128xbf16>, vector<8x128xf32> -> vector<8x128xf32>
    %21 = arith.maximumf %16, %20 : vector<8x128xf32>
    %cst_22 = arith.constant 0.000000e+00 : f32
    %22 = vector.broadcast %cst_22 : f32 to vector<8x128xf32>
    %23 = arith.maximumf %21, %22 : vector<8x128xf32>
    %24 = arith.truncf %23 : vector<8x128xf32> to vector<8x128xbf16>
    %c0_23 = arith.constant 0 : index
    %c128 = arith.constant 128 : index
    %25 = vector.load %arg7[%c0_23, %c128] : memref<8x1024xbf16, #tpu.memory_space<vmem>>, vector<8x128xbf16>
    tpu.vector_store %arg7[%c0_23, %c128], %24 {strides = array<i32>} : memref<8x1024xbf16, #tpu.memory_space<vmem>>, vector<8x128xbf16>,
    %c2 = arith.constant 2 : index
    %c0_24 = arith.constant 0 : index
    %c0_25 = arith.constant 0 : index
    %26 = vector.load %arg1[%c2, %c0_24, %c0_25] : memref<12x8x128xbf16, #tpu.memory_space<vmem>>, vector<1x8x128xbf16>
    %27 = vector.shape_cast %26 : vector<1x8x128xbf16> to vector<8x128xbf16>
    %c0_26 = arith.constant 0 : index
    %c0_27 = arith.constant 0 : index
    %28 = vector.load %arg2[%c0_26, %c0_27] : memref<128x128xbf16, #tpu.memory_space<vmem>>, vector<128x128xbf16>
    %cst_28 = arith.constant dense<0.000000e+00> : vector<8x128xf32>
    %29 = tpu.matmul %27, %28, %cst_28 {dimension_numbers = #tpu.dot_dimension_numbers<[1], [0], [0], [1], [0, 0, 1, 1], [], []>} : vector<8x128xbf16>, vector<128x128xbf16>, vector<8x128xf32> -> vector<8x128xf32>
    %c8 = arith.constant 8 : index
    %c0_29 = arith.constant 0 : index
    %c0_30 = arith.constant 0 : index
    %30 = vector.load %arg1[%c8, %c0_29, %c0_30] : memref<12x8x128xbf16, #tpu.memory_space<vmem>>, vector<1x8x128xbf16>
    %31 = vector.shape_cast %30 : vector<1x8x128xbf16> to vector<8x128xbf16>
    %c0_31 = arith.constant 0 : index
    %c0_32 = arith.constant 0 : index
    %32 = vector.load %arg2[%c0_31, %c0_32] : memref<128x128xbf16, #tpu.memory_space<vmem>>, vector<128x128xbf16>
    %cst_33 = arith.constant dense<0.000000e+00> : vector<8x128xf32>
    %33 = tpu.matmul %31, %32, %cst_33 {dimension_numbers = #tpu.dot_dimension_numbers<[1], [0], [0], [1], [0, 0, 1, 1], [], []>} : vector<8x128xbf16>, vector<128x128xbf16>, vector<8x128xf32> -> vector<8x128xf32>
    %34 = arith.maximumf %29, %33 : vector<8x128xf32>
    %cst_34 = arith.constant 0.000000e+00 : f32
    %35 = vector.broadcast %cst_34 : f32 to vector<8x128xf32>
    %36 = arith.maximumf %34, %35 : vector<8x128xf32>
    %37 = arith.truncf %36 : vector<8x128xf32> to vector<8x128xbf16>
    %c0_35 = arith.constant 0 : index
    %c256 = arith.constant 256 : index
    %38 = vector.load %arg7[%c0_35, %c256] : memref<8x1024xbf16, #tpu.memory_space<vmem>>, vector<8x128xbf16>
    tpu.vector_store %arg7[%c0_35, %c256], %37 {strides = array<i32>} : memref<8x1024xbf16, #tpu.memory_space<vmem>>, vector<8x128xbf16>,
    %c3 = arith.constant 3 : index
    %c0_36 = arith.constant 0 : index
    %c0_37 = arith.constant 0 : index
    %39 = vector.load %arg1[%c3, %c0_36, %c0_37] : memref<12x8x128xbf16, #tpu.memory_space<vmem>>, vector<1x8x128xbf16>
    %40 = vector.shape_cast %39 : vector<1x8x128xbf16> to vector<8x128xbf16>
    %c0_38 = arith.constant 0 : index
    %c0_39 = arith.constant 0 : index
    %41 = vector.load %arg2[%c0_38, %c0_39] : memref<128x128xbf16, #tpu.memory_space<vmem>>, vector<128x128xbf16>
    %cst_40 = arith.constant dense<0.000000e+00> : vector<8x128xf32>
    %42 = tpu.matmul %40, %41, %cst_40 {dimension_numbers = #tpu.dot_dimension_numbers<[1], [0], [0], [1], [0, 0, 1, 1], [], []>} : vector<8x128xbf16>, vector<128x128xbf16>, vector<8x128xf32> -> vector<8x128xf32>
    %c9 = arith.constant 9 : index
    %c0_41 = arith.constant 0 : index
    %c0_42 = arith.constant 0 : index
    %43 = vector.load %arg1[%c9, %c0_41, %c0_42] : memref<12x8x128xbf16, #tpu.memory_space<vmem>>, vector<1x8x128xbf16>
    %44 = vector.shape_cast %43 : vector<1x8x128xbf16> to vector<8x128xbf16>
    %c0_43 = arith.constant 0 : index
    %c0_44 = arith.constant 0 : index
    %45 = vector.load %arg2[%c0_43, %c0_44] : memref<128x128xbf16, #tpu.memory_space<vmem>>, vector<128x128xbf16>
    %cst_45 = arith.constant dense<0.000000e+00> : vector<8x128xf32>
    %46 = tpu.matmul %44, %45, %cst_45 {dimension_numbers = #tpu.dot_dimension_numbers<[1], [0], [0], [1], [0, 0, 1, 1], [], []>} : vector<8x128xbf16>, vector<128x128xbf16>, vector<8x128xf32> -> vector<8x128xf32>
    %47 = arith.maximumf %42, %46 : vector<8x128xf32>
    %cst_46 = arith.constant 0.000000e+00 : f32
    %48 = vector.broadcast %cst_46 : f32 to vector<8x128xf32>
    %49 = arith.maximumf %47, %48 : vector<8x128xf32>
    %50 = arith.truncf %49 : vector<8x128xf32> to vector<8x128xbf16>
    %c0_47 = arith.constant 0 : index
    %c384 = arith.constant 384 : index
    %51 = vector.load %arg7[%c0_47, %c384] : memref<8x1024xbf16, #tpu.memory_space<vmem>>, vector<8x128xbf16>
    tpu.vector_store %arg7[%c0_47, %c384], %50 {strides = array<i32>} : memref<8x1024xbf16, #tpu.memory_space<vmem>>, vector<8x128xbf16>,
    %c4 = arith.constant 4 : index
    %c0_48 = arith.constant 0 : index
    %c0_49 = arith.constant 0 : index
    %52 = vector.load %arg1[%c4, %c0_48, %c0_49] : memref<12x8x128xbf16, #tpu.memory_space<vmem>>, vector<1x8x128xbf16>
    %53 = vector.shape_cast %52 : vector<1x8x128xbf16> to vector<8x128xbf16>
    %c0_50 = arith.constant 0 : index
    %c0_51 = arith.constant 0 : index
    %54 = vector.load %arg3[%c0_50, %c0_51] : memref<128x256xbf16, #tpu.memory_space<vmem>>, vector<128x256xbf16>
    %cst_52 = arith.constant dense<0.000000e+00> : vector<8x256xf32>
    %55 = tpu.matmul %53, %54, %cst_52 {dimension_numbers = #tpu.dot_dimension_numbers<[1], [0], [0], [1], [0, 0, 1, 1], [], []>} : vector<8x128xbf16>, vector<128x256xbf16>, vector<8x256xf32> -> vector<8x256xf32>
    %c10 = arith.constant 10 : index
    %c0_53 = arith.constant 0 : index
    %c0_54 = arith.constant 0 : index
    %56 = vector.load %arg1[%c10, %c0_53, %c0_54] : memref<12x8x128xbf16, #tpu.memory_space<vmem>>, vector<1x8x128xbf16>
    %57 = vector.shape_cast %56 : vector<1x8x128xbf16> to vector<8x128xbf16>
    %c0_55 = arith.constant 0 : index
    %c0_56 = arith.constant 0 : index
    %58 = vector.load %arg3[%c0_55, %c0_56] : memref<128x256xbf16, #tpu.memory_space<vmem>>, vector<128x256xbf16>
    %cst_57 = arith.constant dense<0.000000e+00> : vector<8x256xf32>
    %59 = tpu.matmul %57, %58, %cst_57 {dimension_numbers = #tpu.dot_dimension_numbers<[1], [0], [0], [1], [0, 0, 1, 1], [], []>} : vector<8x128xbf16>, vector<128x256xbf16>, vector<8x256xf32> -> vector<8x256xf32>
    %60 = arith.maximumf %55, %59 : vector<8x256xf32>
    %cst_58 = arith.constant 0.000000e+00 : f32
    %61 = vector.broadcast %cst_58 : f32 to vector<8x256xf32>
    %62 = arith.maximumf %60, %61 : vector<8x256xf32>
    %63 = arith.truncf %62 : vector<8x256xf32> to vector<8x256xbf16>
    %c0_59 = arith.constant 0 : index
    %c512 = arith.constant 512 : index
    %64 = vector.load %arg7[%c0_59, %c512] : memref<8x1024xbf16, #tpu.memory_space<vmem>>, vector<8x256xbf16>
    tpu.vector_store %arg7[%c0_59, %c512], %63 {strides = array<i32>} : memref<8x1024xbf16, #tpu.memory_space<vmem>>, vector<8x256xbf16>,
    %c5 = arith.constant 5 : index
    %c0_60 = arith.constant 0 : index
    %c0_61 = arith.constant 0 : index
    %65 = vector.load %arg1[%c5, %c0_60, %c0_61] : memref<12x8x128xbf16, #tpu.memory_space<vmem>>, vector<1x8x128xbf16>
    %66 = vector.shape_cast %65 : vector<1x8x128xbf16> to vector<8x128xbf16>
    %c0_62 = arith.constant 0 : index
    %c0_63 = arith.constant 0 : index
    %67 = vector.load %arg3[%c0_62, %c0_63] : memref<128x256xbf16, #tpu.memory_space<vmem>>, vector<128x256xbf16>
    %cst_64 = arith.constant dense<0.000000e+00> : vector<8x256xf32>
    %68 = tpu.matmul %66, %67, %cst_64 {dimension_numbers = #tpu.dot_dimension_numbers<[1], [0], [0], [1], [0, 0, 1, 1], [], []>} : vector<8x128xbf16>, vector<128x256xbf16>, vector<8x256xf32> -> vector<8x256xf32>
    %c11 = arith.constant 11 : index
    %c0_65 = arith.constant 0 : index
    %c0_66 = arith.constant 0 : index
    %69 = vector.load %arg1[%c11, %c0_65, %c0_66] : memref<12x8x128xbf16, #tpu.memory_space<vmem>>, vector<1x8x128xbf16>
    %70 = vector.shape_cast %69 : vector<1x8x128xbf16> to vector<8x128xbf16>
    %c0_67 = arith.constant 0 : index
    %c0_68 = arith.constant 0 : index
    %71 = vector.load %arg3[%c0_67, %c0_68] : memref<128x256xbf16, #tpu.memory_space<vmem>>, vector<128x256xbf16>
    %cst_69 = arith.constant dense<0.000000e+00> : vector<8x256xf32>
    %72 = tpu.matmul %70, %71, %cst_69 {dimension_numbers = #tpu.dot_dimension_numbers<[1], [0], [0], [1], [0, 0, 1, 1], [], []>} : vector<8x128xbf16>, vector<128x256xbf16>, vector<8x256xf32> -> vector<8x256xf32>
    %73 = arith.maximumf %68, %72 : vector<8x256xf32>
    %cst_70 = arith.constant 0.000000e+00 : f32
    %74 = vector.broadcast %cst_70 : f32 to vector<8x256xf32>
    %75 = arith.maximumf %73, %74 : vector<8x256xf32>
    %76 = arith.truncf %75 : vector<8x256xf32> to vector<8x256xbf16>
    %c0_71 = arith.constant 0 : index
    %c768 = arith.constant 768 : index
    %77 = vector.load %arg7[%c0_71, %c768] : memref<8x1024xbf16, #tpu.memory_space<vmem>>, vector<8x256xbf16>
    tpu.vector_store %arg7[%c0_71, %c768], %76 {strides = array<i32>} : memref<8x1024xbf16, #tpu.memory_space<vmem>>, vector<8x256xbf16>,
    %c0_72 = arith.constant 0 : index
    %c0_73 = arith.constant 0 : index
    %78 = vector.load %arg7[%c0_72, %c0_73] : memref<8x1024xbf16, #tpu.memory_space<vmem>>, vector<8x1024xbf16>
    %c0_74 = arith.constant 0 : index
    %c0_75 = arith.constant 0 : index
    %79 = vector.load %arg4[%c0_74, %c0_75] : memref<1024x128xbf16, #tpu.memory_space<vmem>>, vector<1024x128xbf16>
    %cst_76 = arith.constant dense<0.000000e+00> : vector<8x128xf32>
    %80 = tpu.matmul %78, %79, %cst_76 {dimension_numbers = #tpu.dot_dimension_numbers<[1], [0], [0], [1], [0, 0, 1, 1], [], []>} : vector<8x1024xbf16>, vector<1024x128xbf16>, vector<8x128xf32> -> vector<8x128xf32>
    %c0_77 = arith.constant 0 : index
    %c0_78 = arith.constant 0 : index
    %81 = vector.load %arg5[%c0_77, %c0_78] : memref<1x128xf32, #tpu.memory_space<vmem>>, vector<1x128xf32>
    %82 = vector.broadcast %81 : vector<1x128xf32> to vector<8x128xf32>
    %83 = arith.addf %80, %82 : vector<8x128xf32>
    %c0_79 = arith.constant 0 : index
    %c0_80 = arith.constant 0 : index
    %84 = vector.load %arg6[%c0_79, %c0_80] : memref<8x128xf32, #tpu.memory_space<vmem>>, vector<8x128xf32>
    tpu.vector_store %arg6[%c0_79, %c0_80], %83 {strides = array<i32>} : memref<8x128xf32, #tpu.memory_space<vmem>>, vector<8x128xf32>,
    return
  }
  func.func @transform_0(%arg0: i32) -> (i32, i32, i32) {
    %c0_i32 = arith.constant 0 : i32
    %c0_i32_0 = arith.constant 0 : i32
    %c0_i32_1 = arith.constant 0 : i32
    return %c0_i32, %arg0, %c0_i32_0 : i32, i32, i32
  }
  func.func @transform_1(%arg0: i32) -> (i32, i32) {
    %c0_i32 = arith.constant 0 : i32
    %c0_i32_0 = arith.constant 0 : i32
    %c0_i32_1 = arith.constant 0 : i32
    return %c0_i32, %c0_i32_0 : i32, i32
  }
  func.func @transform_2(%arg0: i32) -> (i32, i32) {
    %c0_i32 = arith.constant 0 : i32
    %c0_i32_0 = arith.constant 0 : i32
    %c0_i32_1 = arith.constant 0 : i32
    return %c0_i32, %c0_i32_0 : i32, i32
  }
  func.func @transform_3(%arg0: i32) -> (i32, i32) {
    %c0_i32 = arith.constant 0 : i32
    %c0_i32_0 = arith.constant 0 : i32
    %c0_i32_1 = arith.constant 0 : i32
    return %c0_i32, %c0_i32_0 : i32, i32
  }
  func.func @transform_4(%arg0: i32) -> (i32, i32) {
    %c0_i32 = arith.constant 0 : i32
    %c0_i32_0 = arith.constant 0 : i32
    %c0_i32_1 = arith.constant 0 : i32
    return %c0_i32, %c0_i32_0 : i32, i32
  }
  func.func @transform_5(%arg0: i32) -> (i32, i32) {
    %c0_i32 = arith.constant 0 : i32
    %c0_i32_0 = arith.constant 0 : i32
    return %arg0, %c0_i32 : i32, i32
  }
}

</mosaic_0001>

<bundles_post_ra>
// kernel: net_d_forward.1
= control target key start
LH: loop header
LB: loop body
LE: loop exit
PB: predicated region body
PF: predicated region fallthrough
CT: control target
= control target key end

     0   :  { %v2337_v0 = vmov 0.0   ;;  %vm2338_vm0 = vmmov 0   ;;  %v2339_v46 = vmov 0   ;;  %s2834_s1 = inlined_call_operand.vmem [shape: bf16[128,128], index: 1, kind: input, shape index: {}]   ;;  %s2835_s0 = inlined_call_operand.vmem [shape: bf16[12,8,128], index: 0, kind: input, shape index: {}]   ;;  %s2836_s2 = inlined_call_operand.vmem [shape: bf16[128,256], index: 2, kind: input, shape index: {}]   ;;  %s2837_s3 = inlined_call_operand.vmem [shape: bf16[1024,128], index: 3, kind: input, shape index: {}]   ;;  %s2838_s4 = inlined_call_operand.vmem [shape: f32[1,128], index: 4, kind: input, shape index: {}]   ;;  %s2839_s5 = inlined_call_operand.vmem [shape: f32[8,128], index: 5, kind: output, shape index: {}]  }
   0x1   :  { %2046 = vmatprep.subr.bf16.mxu0 %v2337_v0  ;;  %2066 = vmatprep.subr.bf16.mxu1 %v2337_v0  ;;  %v2209_v1 = vld [vmem:[%s2834_s1 + $0x38] sm:$0xff]   ;;  %v2210_v2 = vld [vmem:[%s2834_s1 + $0x30] sm:$0xff]   ;;  %v2211_v3 = vld [vmem:[%s2834_s1 + $0x28] sm:$0xff]  }
   0x2   :  { %2062 = vmatprep.mubr.msk.bf16.mxu0 %vm2338_vm0, %v2337_v0  ;;  %2082 = vmatprep.mubr.msk.bf16.mxu1 %vm2338_vm0, %v2337_v0  ;;  %v2212_v4 = vld [vmem:[%s2834_s1 + $0x20] sm:$0xff]   ;;  %v2213_v5 = vld [vmem:[%s2834_s1 + $0x18] sm:$0xff]   ;;  %v2214_v6 = vld [vmem:[%s2834_s1 + $0x10] sm:$0xff]  }
   0x3   :  { %2047 = vmatpush3.bf16.msra.mxu0 %v2209_v1  ;;  %2067 = vmatpush3.bf16.msra.mxu1 %v2209_v1  ;;  %v2215_v7 = vld [vmem:[%s2834_s1 + $0x8] sm:$0xff]   ;;  %v2216_v8 = vld [vmem:[%s2834_s1] sm:$0xff]   ;;  %v1742_v10 = vld [vmem:[%s2835_s0 + $0x18] sm:$0xf] }
   0x4   :  { %2048 = vmatprep.subr.bf16.mxu0 %v2337_v0  ;;  %2068 = vmatprep.subr.bf16.mxu1 %v2337_v0  ;;  %v21_v9 = vld [vmem:[%s2835_s0] sm:$0xf]  ;;  %v2217_v11 = vld [vmem:[%s2834_s1 + $0x38] sm:$0xff]   ;;  %v2218_v12 = vld [vmem:[%s2834_s1 + $0x30] sm:$0xff]  }
   0x5   :  { %v2219_v13 = vld [vmem:[%s2834_s1 + $0x28] sm:$0xff]   ;;  %v2220_v14 = vld [vmem:[%s2834_s1 + $0x20] sm:$0xff]   ;;  %v2221_v15 = vld [vmem:[%s2834_s1 + $0x18] sm:$0xff]  }
   0x6   :  { %v2222_v16 = vld [vmem:[%s2834_s1 + $0x10] sm:$0xff]   ;;  %v2223_v17 = vld [vmem:[%s2834_s1 + $0x8] sm:$0xff]   ;;  %v2224_v18 = vld [vmem:[%s2834_s1] sm:$0xff]  }
   0x7   :  { %2049 = vmatpush3.bf16.msra.mxu0 %v2210_v2  ;;  %2069 = vmatpush3.bf16.msra.mxu1 %v2210_v2  ;;  %v1743_v19 = vld [vmem:[%s2835_s0 + $0x4] sm:$0xf]  ;;  %v1752_v20 = vld [vmem:[%s2835_s0 + $0x1c] sm:$0xf]  ;;  %v2226_v22 = vld [vmem:[%s2834_s1 + $0x30] sm:$0xff]  }
   0x8   :  { %2050 = vmatprep.subr.bf16.mxu0 %v2337_v0  ;;  %2070 = vmatprep.subr.bf16.mxu1 %v2337_v0  ;;  %v2225_v21 = vld [vmem:[%s2834_s1 + $0x38] sm:$0xff]   ;;  %v2227_v23 = vld [vmem:[%s2834_s1 + $0x28] sm:$0xff]   ;;  %v2228_v24 = vld [vmem:[%s2834_s1 + $0x20] sm:$0xff]  }
   0x9   :  { %v2229_v25 = vld [vmem:[%s2834_s1 + $0x18] sm:$0xff]   ;;  %v2230_v26 = vld [vmem:[%s2834_s1 + $0x10] sm:$0xff]   ;;  %v2231_v27 = vld [vmem:[%s2834_s1 + $0x8] sm:$0xff]  }
   0xa   :  { %v2232_v28 = vld [vmem:[%s2834_s1] sm:$0xff]   ;;  %v1753_v29 = vld [vmem:[%s2835_s0 + $0x8] sm:$0xf]  ;;  %v2233_v31 = vld [vmem:[%s2834_s1 + $0x38] sm:$0xff]  }
   0xb   :  { %2051 = vmatpush3.bf16.msra.mxu0 %v2211_v3  ;;  %2071 = vmatpush3.bf16.msra.mxu1 %v2211_v3  ;;  %v1762_v30 = vld [vmem:[%s2835_s0 + $0x20] sm:$0xf]  ;;  %v2234_v32 = vld [vmem:[%s2834_s1 + $0x30] sm:$0xff]   ;;  %v2235_v33 = vld [vmem:[%s2834_s1 + $0x28] sm:$0xff]  }
   0xc   :  { %2052 = vmatprep.subr.bf16.mxu0 %v2337_v0  ;;  %2072 = vmatprep.subr.bf16.mxu1 %v2337_v0  ;;  %v2236_v34 = vld [vmem:[%s2834_s1 + $0x20] sm:$0xff]   ;;  %v2237_v35 = vld [vmem:[%s2834_s1 + $0x18] sm:$0xff]   ;;  %v2238_v36 = vld [vmem:[%s2834_s1 + $0x10] sm:$0xff]  }
   0xd   :  { %v2239_v37 = vld [vmem:[%s2834_s1 + $0x8] sm:$0xff]   ;;  %v2240_v38 = vld [vmem:[%s2834_s1] sm:$0xff]   ;;  %v2565_v39 = vld [vmem:[%s2836_s2 + $0x74] ss:$8 sps:$4 sm:$0xff]  }
   0xe   :  { %v1763_v40 = vld [vmem:[%s2835_s0 + $0xc] sm:$0xf]  ;;  %v1772_v41 = vld [vmem:[%s2835_s0 + $0x24] sm:$0xf]  ;;  %v2241_v42 = vld [vmem:[%s2836_s2 + $0x70] ss:$8 sps:$4 sm:$0xff]  }
   0xf   :  { %2053 = vmatpush3.bf16.msra.mxu0 %v2212_v4  ;;  %2073 = vmatpush3.bf16.msra.mxu1 %v2212_v4  ;;  %v2246_v43 = vld [vmem:[%s2836_s2 + $0x64] ss:$8 sps:$4 sm:$0xff]   ;;  %v2244_v44 = vld [vmem:[%s2836_s2 + $0x60] ss:$8 sps:$4 sm:$0xff]   ;;  %v2249_v45 = vld [vmem:[%s2836_s2 + $0x54] ss:$8 sps:$4 sm:$0xff]  }
  0x10   :  { %2054 = vmatprep.subr.bf16.mxu0 %v2337_v0  ;;  %2074 = vmatprep.subr.bf16.mxu1 %v2337_v0  ;;  %v2247_v47 = vld [vmem:[%s2836_s2 + $0x50] ss:$8 sps:$4 sm:$0xff]   ;;  %v2252_v48 = vld [vmem:[%s2836_s2 + $0x44] ss:$8 sps:$4 sm:$0xff]   ;;  %v2250_v49 = vld [vmem:[%s2836_s2 + $0x40] ss:$8 sps:$4 sm:$0xff]  }
  0x11   :  { %v2255_v50 = vld [vmem:[%s2836_s2 + $0x34] ss:$8 sps:$4 sm:$0xff]   ;;  %v2253_v51 = vld [vmem:[%s2836_s2 + $0x30] ss:$8 sps:$4 sm:$0xff]   ;;  %v2258_v52 = vld [vmem:[%s2836_s2 + $0x24] ss:$8 sps:$4 sm:$0xff]  }
  0x12   :  { %v2256_v53 = vld [vmem:[%s2836_s2 + $0x20] ss:$8 sps:$4 sm:$0xff]   ;;  %v2261_v54 = vld [vmem:[%s2836_s2 + $0x14] ss:$8 sps:$4 sm:$0xff]   ;;  %v2259_v55 = vld [vmem:[%s2836_s2 + $0x10] ss:$8 sps:$4 sm:$0xff]  }
  0x13   :  { %2055 = vmatpush3.bf16.msra.mxu0 %v2213_v5  ;;  %2075 = vmatpush3.bf16.msra.mxu1 %v2213_v5  ;;  %v2264_v56 = vld [vmem:[%s2836_s2 + $0x4] ss:$8 sps:$4 sm:$0xff]   ;;  %v2262_v57 = vld [vmem:[%s2836_s2] ss:$8 sps:$4 sm:$0xff]   ;;  %v1773_v58 = vld [vmem:[%s2835_s0 + $0x10] sm:$0xf] }
  0x14   :  { %2056 = vmatprep.subr.bf16.mxu0 %v2337_v0  ;;  %2076 = vmatprep.subr.bf16.mxu1 %v2337_v0  ;;  %v1790_v59 = vld [vmem:[%s2835_s0 + $0x28] sm:$0xf]  ;;  %v2265_v60 = vld [vmem:[%s2837_s3 + $0x78] sm:$0xff]   ;;  %v1792_v62 = vld [vmem:[%s2835_s0 + $0x14] sm:$0xf] }
  0x15   :  { %v2283_v61 = vld [vmem:[%s2837_s3 + $0xf8] sm:$0xff]   ;;  %v1809_v63 = vld [vmem:[%s2835_s0 + $0x2c] sm:$0xf]  ;;  %v2267_v2 = vld [vmem:[%s2837_s3 + $0x70] sm:$0xff]  }
  0x16   :  { %v2284_v1 = vld [vmem:[%s2837_s3 + $0xb8] sm:$0xff]   ;;  %v2285_v3 = vld [vmem:[%s2837_s3 + $0xf0] sm:$0xff]  }
  0x17   :  { %2057 = vmatpush3.bf16.msra.mxu0 %v2214_v6  ;;  %2077 = vmatpush3.bf16.msra.mxu1 %v2214_v6  ;;  %v2268_v4 = vld [vmem:[%s2837_s3 + $0x30] sm:$0xff]   ;;  %v2269_v6 = vld [vmem:[%s2837_s3 + $0x68] sm:$0xff]  }
  0x18   :  { %2058 = vmatprep.subr.bf16.mxu0 %v2337_v0  ;;  %2078 = vmatprep.subr.bf16.mxu1 %v2337_v0  ;;  %v2286_v5 = vld [vmem:[%s2837_s3 + $0xb0] sm:$0xff]  }
  0x1b   :  { %2059 = vmatpush3.bf16.msra.mxu0 %v2215_v7  ;;  %2079 = vmatpush3.bf16.msra.mxu1 %v2215_v7  ;;  %v2287_v7 = vld [vmem:[%s2837_s3 + $0xe8] sm:$0xff]  }
  0x1c   :  { %2060 = vmatprep.subr.bf16.mxu0 %v2337_v0  ;;  %2080 = vmatprep.subr.bf16.mxu1 %v2337_v0 }
  0x1f   :  { %2061 = vmatpush3.bf16.msra.mxu0 %v2216_v8  ;;  %2081 = vmatpush3.bf16.msra.mxu1 %v2216_v8  ;;  %v2270_v8 = vld [vmem:[%s2837_s3 + $0x28] sm:$0xff]  }
  0x20   :  { %2086 = vmatprep.subr.bf16.mxu0 %v2337_v0  ;;  %2106 = vmatprep.subr.bf16.mxu1 %v2337_v0 }
  0x22   :  { %2063 = vmatmul.mubr.bf16.vlgmr.msra.gmra.mxu0 %v21_v9  ;;  %2083 = vmatmul.mubr.bf16.vlgmr.msra.gmra.mxu1 %v1742_v10  ;;  %v2288_v9 = vld [vmem:[%s2837_s3 + $0xa8] sm:$0xff]   ;;  %v2271_v10 = vld [vmem:[%s2837_s3 + $0x60] sm:$0xff]  }
  0x23   :  { %2087 = vmatpush3.bf16.msra.mxu0 %v2217_v11  ;;  %2107 = vmatpush3.bf16.msra.mxu1 %v2217_v11  ;;  %v2289_v11 = vld [vmem:[%s2837_s3 + $0xe0] sm:$0xff]  }
  0x24   :  { %2088 = vmatprep.subr.bf16.mxu0 %v2337_v0  ;;  %2108 = vmatprep.subr.bf16.mxu1 %v2337_v0 }
  0x25   :  { %2102 = vmatprep.mubr.msk.bf16.mxu0 %vm2338_vm0, %v2337_v0  ;;  %2122 = vmatprep.mubr.msk.bf16.mxu1 %vm2338_vm0, %v2337_v0 }
  0x27   :  { %2089 = vmatpush3.bf16.msra.mxu0 %v2218_v12  ;;  %2109 = vmatpush3.bf16.msra.mxu1 %v2218_v12  ;;  %v2272_v12 = vld [vmem:[%s2837_s3 + $0x20] sm:$0xff]  }
  0x28   :  { %2090 = vmatprep.subr.bf16.mxu0 %v2337_v0  ;;  %2110 = vmatprep.subr.bf16.mxu1 %v2337_v0 }
  0x2b   :  { %2091 = vmatpush3.bf16.msra.mxu0 %v2219_v13  ;;  %2111 = vmatpush3.bf16.msra.mxu1 %v2219_v13  ;;  %v2290_v13 = vld [vmem:[%s2837_s3 + $0xa0] sm:$0xff]  }
  0x2c   :  { %2092 = vmatprep.subr.bf16.mxu0 %v2337_v0  ;;  %2112 = vmatprep.subr.bf16.mxu1 %v2337_v0 }
  0x2f   :  { %2093 = vmatpush3.bf16.msra.mxu0 %v2220_v14  ;;  %2113 = vmatpush3.bf16.msra.mxu1 %v2220_v14  ;;  %v2273_v14 = vld [vmem:[%s2837_s3 + $0x58] sm:$0xff]  }
  0x30   :  { %2094 = vmatprep.subr.bf16.mxu0 %v2337_v0  ;;  %2114 = vmatprep.subr.bf16.mxu1 %v2337_v0 }
  0x33   :  { %2095 = vmatpush3.bf16.msra.mxu0 %v2221_v15  ;;  %2115 = vmatpush3.bf16.msra.mxu1 %v2221_v15  ;;  %v2291_v15 = vld [vmem:[%s2837_s3 + $0xd8] sm:$0xff]  }
  0x34   :  { %2096 = vmatprep.subr.bf16.mxu0 %v2337_v0  ;;  %2116 = vmatprep.subr.bf16.mxu1 %v2337_v0 }
  0x37   :  { %2097 = vmatpush3.bf16.msra.mxu0 %v2222_v16  ;;  %2117 = vmatpush3.bf16.msra.mxu1 %v2222_v16  ;;  %v2274_v16 = vld [vmem:[%s2837_s3 + $0x18] sm:$0xff]  }
  0x38   :  { %2098 = vmatprep.subr.bf16.mxu0 %v2337_v0  ;;  %2118 = vmatprep.subr.bf16.mxu1 %v2337_v0 }
  0x3b   :  { %2099 = vmatpush3.bf16.msra.mxu0 %v2223_v17  ;;  %2119 = vmatpush3.bf16.msra.mxu1 %v2223_v17  ;;  %v2292_v17 = vld [vmem:[%s2837_s3 + $0x98] sm:$0xff]  }
  0x3c   :  { %2100 = vmatprep.subr.bf16.mxu0 %v2337_v0  ;;  %2120 = vmatprep.subr.bf16.mxu1 %v2337_v0 }
  0x3f   :  { %2101 = vmatpush3.bf16.msra.mxu0 %v2224_v18  ;;  %2121 = vmatpush3.bf16.msra.mxu1 %v2224_v18  ;;  %v2275_v18 = vld [vmem:[%s2837_s3 + $0x50] sm:$0xff]  }
  0x40   :  { %2126 = vmatprep.subr.bf16.mxu0 %v2337_v0  ;;  %2146 = vmatprep.subr.bf16.mxu1 %v2337_v0 }
  0x42   :  { %2103 = vmatmul.mubr.bf16.vlgmr.msra.gmra.mxu0 %v1743_v19  ;;  %2123 = vmatmul.mubr.bf16.vlgmr.msra.gmra.mxu1 %v1752_v20  ;;  %v2293_v19 = vld [vmem:[%s2837_s3 + $0xd0] sm:$0xff]  }
  0x43   :  { %2127 = vmatpush3.bf16.msra.mxu0 %v2225_v21  ;;  %2147 = vmatpush3.bf16.msra.mxu1 %v2225_v21  ;;  %v2276_v20 = vld [vmem:[%s2837_s3 + $0x10] sm:$0xff]  }
  0x44   :  { %2128 = vmatprep.subr.bf16.mxu0 %v2337_v0  ;;  %2148 = vmatprep.subr.bf16.mxu1 %v2337_v0  ;;  %v2294_v21 = vld [vmem:[%s2837_s3 + $0x90] sm:$0xff]  }
  0x45   :  { %2142 = vmatprep.mubr.msk.bf16.mxu0 %vm2338_vm0, %v2337_v0  ;;  %2162 = vmatprep.mubr.msk.bf16.mxu1 %vm2338_vm0, %v2337_v0 }
  0x47   :  { %2129 = vmatpush3.bf16.msra.mxu0 %v2226_v22  ;;  %2149 = vmatpush3.bf16.msra.mxu1 %v2226_v22  ;;  %v2277_v22 = vld [vmem:[%s2837_s3 + $0x48] sm:$0xff]  }
  0x48   :  { %2130 = vmatprep.subr.bf16.mxu0 %v2337_v0  ;;  %2150 = vmatprep.subr.bf16.mxu1 %v2337_v0 }
  0x4b   :  { %2131 = vmatpush3.bf16.msra.mxu0 %v2227_v23  ;;  %2151 = vmatpush3.bf16.msra.mxu1 %v2227_v23  ;;  %v2295_v23 = vld [vmem:[%s2837_s3 + $0xc8] sm:$0xff]  }
  0x4c   :  { %2132 = vmatprep.subr.bf16.mxu0 %v2337_v0  ;;  %2152 = vmatprep.subr.bf16.mxu1 %v2337_v0 }
  0x4f   :  { %2133 = vmatpush3.bf16.msra.mxu0 %v2228_v24  ;;  %2153 = vmatpush3.bf16.msra.mxu1 %v2228_v24  ;;  %v2278_v24 = vld [vmem:[%s2837_s3 + $0x8] sm:$0xff]  }
  0x50   :  { %2134 = vmatprep.subr.bf16.mxu0 %v2337_v0  ;;  %2154 = vmatprep.subr.bf16.mxu1 %v2337_v0 }
  0x53   :  { %2135 = vmatpush3.bf16.msra.mxu0 %v2229_v25  ;;  %2155 = vmatpush3.bf16.msra.mxu1 %v2229_v25  ;;  %v2296_v25 = vld [vmem:[%s2837_s3 + $0x88] sm:$0xff]  }
  0x54   :  { %2136 = vmatprep.subr.bf16.mxu0 %v2337_v0  ;;  %2156 = vmatprep.subr.bf16.mxu1 %v2337_v0 }
  0x57   :  { %2137 = vmatpush3.bf16.msra.mxu0 %v2230_v26  ;;  %2157 = vmatpush3.bf16.msra.mxu1 %v2230_v26  ;;  %v2279_v26 = vld [vmem:[%s2837_s3 + $0x40] sm:$0xff]  }
  0x58   :  { %2138 = vmatprep.subr.bf16.mxu0 %v2337_v0  ;;  %2158 = vmatprep.subr.bf16.mxu1 %v2337_v0 }
  0x5b   :  { %2139 = vmatpush3.bf16.msra.mxu0 %v2231_v27  ;;  %2159 = vmatpush3.bf16.msra.mxu1 %v2231_v27  ;;  %v2297_v27 = vld [vmem:[%s2837_s3 + $0xc0] sm:$0xff]  }
  0x5c   :  { %2140 = vmatprep.subr.bf16.mxu0 %v2337_v0  ;;  %2160 = vmatprep.subr.bf16.mxu1 %v2337_v0 }
  0x5f   :  { %2141 = vmatpush3.bf16.msra.mxu0 %v2232_v28  ;;  %2161 = vmatpush3.bf16.msra.mxu1 %v2232_v28  ;;  %v2280_v28 = vld [vmem:[%s2837_s3] sm:$0xff]  }
  0x60   :  { %2166 = vmatprep.subr.bf16.mxu0 %v2337_v0  ;;  %2186 = vmatprep.subr.bf16.mxu1 %v2337_v0 }
  0x62   :  { %2143 = vmatmul.mubr.bf16.vlgmr.msra.gmra.mxu0 %v1753_v29  ;;  %2163 = vmatmul.mubr.bf16.vlgmr.msra.gmra.mxu1 %v1762_v30  ;;  %v2298_v29 = vld [vmem:[%s2837_s3 + $0x80] sm:$0xff]   ;;  %v2301_v30 = vld [vmem:[%s2837_s3 + $0x178] sm:$0xff]  }
  0x63   :  { %2167 = vmatpush3.bf16.msra.mxu0 %v2233_v31  ;;  %2187 = vmatpush3.bf16.msra.mxu1 %v2233_v31 }
  0x64   :  { %2168 = vmatprep.subr.bf16.mxu0 %v2337_v0  ;;  %2188 = vmatprep.subr.bf16.mxu1 %v2337_v0 }
  0x65   :  { %2182 = vmatprep.mubr.msk.bf16.mxu0 %vm2338_vm0, %v2337_v0  ;;  %2202 = vmatprep.mubr.msk.bf16.mxu1 %vm2338_vm0, %v2337_v0 }
  0x67   :  { %2169 = vmatpush3.bf16.msra.mxu0 %v2234_v32  ;;  %2189 = vmatpush3.bf16.msra.mxu1 %v2234_v32 }
  0x68   :  { %2170 = vmatprep.subr.bf16.mxu0 %v2337_v0  ;;  %2190 = vmatprep.subr.bf16.mxu1 %v2337_v0 }
  0x6b   :  { %2171 = vmatpush3.bf16.msra.mxu0 %v2235_v33  ;;  %2191 = vmatpush3.bf16.msra.mxu1 %v2235_v33 }
  0x6c   :  { %2172 = vmatprep.subr.bf16.mxu0 %v2337_v0  ;;  %2192 = vmatprep.subr.bf16.mxu1 %v2337_v0 }
  0x6f   :  { %2173 = vmatpush3.bf16.msra.mxu0 %v2236_v34  ;;  %2193 = vmatpush3.bf16.msra.mxu1 %v2236_v34 }
  0x70   :  { %2174 = vmatprep.subr.bf16.mxu0 %v2337_v0  ;;  %2194 = vmatprep.subr.bf16.mxu1 %v2337_v0 }
  0x73   :  { %2175 = vmatpush3.bf16.msra.mxu0 %v2237_v35  ;;  %2195 = vmatpush3.bf16.msra.mxu1 %v2237_v35 }
  0x74   :  { %2176 = vmatprep.subr.bf16.mxu0 %v2337_v0  ;;  %2196 = vmatprep.subr.bf16.mxu1 %v2337_v0 }
  0x77   :  { %2177 = vmatpush3.bf16.msra.mxu0 %v2238_v36  ;;  %2197 = vmatpush3.bf16.msra.mxu1 %v2238_v36 }
  0x78   :  { %2178 = vmatprep.subr.bf16.mxu0 %v2337_v0  ;;  %2198 = vmatprep.subr.bf16.mxu1 %v2337_v0 }
  0x7b   :  { %2179 = vmatpush3.bf16.msra.mxu0 %v2239_v37  ;;  %2199 = vmatpush3.bf16.msra.mxu1 %v2239_v37 }
  0x7c   :  { %2180 = vmatprep.subr.bf16.mxu0 %v2337_v0  ;;  %2200 = vmatprep.subr.bf16.mxu1 %v2337_v0  ;;  %v2266_v0 = vld [vmem:[%s2837_s3 + $0x38] sm:$0xff]  }
  0x7f   :  { %2181 = vmatpush3.bf16.msra.mxu0 %v2240_v38  ;;  %2201 = vmatpush3.bf16.msra.mxu1 %v2240_v38 }
  0x80   :  { %726 = vmatprep.subr.bf16.mxu0 %v2565_v39  ;;  %769 = vmatprep.subr.bf16.mxu1 %v2565_v39 }
  0x82   :  { %2183 = vmatmul.mubr.bf16.vlgmr.msra.gmra.mxu0 %v1763_v40  ;;  %2203 = vmatmul.mubr.bf16.vlgmr.msra.gmra.mxu1 %v1772_v41 }
  0x83   :  { %727 = vmatpush1.bf16.msra.mxu0 %v2241_v42  ;;  %770 = vmatpush1.bf16.msra.mxu1 %v2241_v42 }
  0x84   :  { %728 = vmatprep.subr.bf16.mxu0 %v2246_v43  ;;  %771 = vmatprep.subr.bf16.mxu1 %v2246_v43 }
  0x85   :  { %758 = vmatprep.mubr.bf16.mxu0 %v2339_v46  ;;  %801 = vmatprep.mubr.bf16.mxu1 %v2339_v46 }
  0x87   :  { %729 = vmatpush1.bf16.msra.mxu0 %v2244_v44  ;;  %772 = vmatpush1.bf16.msra.mxu1 %v2244_v44 }
  0x88   :  { %730 = vmatprep.subr.bf16.mxu0 %v2249_v45  ;;  %773 = vmatprep.subr.bf16.mxu1 %v2249_v45 }
  0x8b   :  { %731 = vmatpush1.bf16.msra.mxu0 %v2247_v47  ;;  %774 = vmatpush1.bf16.msra.mxu1 %v2247_v47 }
  0x8c   :  { %732 = vmatprep.subr.bf16.mxu0 %v2252_v48  ;;  %775 = vmatprep.subr.bf16.mxu1 %v2252_v48 }
  0x8f   :  { %733 = vmatpush1.bf16.msra.mxu0 %v2250_v49  ;;  %776 = vmatpush1.bf16.msra.mxu1 %v2250_v49 }
  0x90   :  { %734 = vmatprep.subr.bf16.mxu0 %v2255_v50  ;;  %777 = vmatprep.subr.bf16.mxu1 %v2255_v50 }
  0x93   :  { %735 = vmatpush1.bf16.msra.mxu0 %v2253_v51  ;;  %778 = vmatpush1.bf16.msra.mxu1 %v2253_v51 }
  0x94   :  { %736 = vmatprep.subr.bf16.mxu0 %v2258_v52  ;;  %779 = vmatprep.subr.bf16.mxu1 %v2258_v52 }
  0x97   :  { %737 = vmatpush1.bf16.msra.mxu0 %v2256_v53  ;;  %780 = vmatpush1.bf16.msra.mxu1 %v2256_v53 }
  0x98   :  { %738 = vmatprep.subr.bf16.mxu0 %v2261_v54  ;;  %781 = vmatprep.subr.bf16.mxu1 %v2261_v54 }
  0x9b   :  { %739 = vmatpush1.bf16.msra.mxu0 %v2259_v55  ;;  %782 = vmatpush1.bf16.msra.mxu1 %v2259_v55 }
  0x9c   :  { %740 = vmatprep.subr.bf16.mxu0 %v2264_v56  ;;  %783 = vmatprep.subr.bf16.mxu1 %v2264_v56 }
  0x9f   :  { %741 = vmatpush1.bf16.msra.mxu0 %v2262_v57  ;;  %784 = vmatpush1.bf16.msra.mxu1 %v2262_v57 }
  0xa0   :  { %921 = vmatprep.subr.bf16.mxu0 %v2565_v39  ;;  %964 = vmatprep.subr.bf16.mxu1 %v2565_v39 }
  0xa2   :  { %759 = vmatmul.mubr.bf16.vlgmr.msra.gmra.mxu0 %v1773_v58  ;;  %802 = vmatmul.mubr.bf16.vlgmr.msra.gmra.mxu1 %v1790_v59  ;;  %v2303_v58 = vld [vmem:[%s2837_s3 + $0x170] sm:$0xff]  }
  0xa3   :  { %922 = vmatpush1.bf16.msra.mxu0 %v2241_v42  ;;  %965 = vmatpush1.bf16.msra.mxu1 %v2241_v42  ;;  %v2317_v42 = vld [vmem:[%s2837_s3 + $0x1f8] sm:$0xff]   ;;  %v2304_v59 = vld [vmem:[%s2837_s3 + $0x130] sm:$0xff]  }
  0xa4   :  { %923 = vmatprep.subr.bf16.mxu0 %v2246_v43  ;;  %966 = vmatprep.subr.bf16.mxu1 %v2246_v43 }
  0xa5   :  { %953 = vmatprep.mubr.bf16.mxu0 %v2339_v46  ;;  %996 = vmatprep.mubr.bf16.mxu1 %v2339_v46 }
  0xa7   :  { %924 = vmatpush1.bf16.msra.mxu0 %v2244_v44  ;;  %967 = vmatpush1.bf16.msra.mxu1 %v2244_v44 }
  0xa8   :  { %925 = vmatprep.subr.bf16.mxu0 %v2249_v45  ;;  %968 = vmatprep.subr.bf16.mxu1 %v2249_v45 }
  0xab   :  { %926 = vmatpush1.bf16.msra.mxu0 %v2247_v47  ;;  %969 = vmatpush1.bf16.msra.mxu1 %v2247_v47 }
  0xac   :  { %927 = vmatprep.subr.bf16.mxu0 %v2252_v48  ;;  %970 = vmatprep.subr.bf16.mxu1 %v2252_v48 }
  0xaf   :  { %928 = vmatpush1.bf16.msra.mxu0 %v2250_v49  ;;  %971 = vmatpush1.bf16.msra.mxu1 %v2250_v49 }
  0xb0   :  { %929 = vmatprep.subr.bf16.mxu0 %v2255_v50  ;;  %972 = vmatprep.subr.bf16.mxu1 %v2255_v50 }
  0xb3   :  { %930 = vmatpush1.bf16.msra.mxu0 %v2253_v51  ;;  %973 = vmatpush1.bf16.msra.mxu1 %v2253_v51 }
  0xb4   :  { %931 = vmatprep.subr.bf16.mxu0 %v2258_v52  ;;  %974 = vmatprep.subr.bf16.mxu1 %v2258_v52 }
  0xb7   :  { %932 = vmatpush1.bf16.msra.mxu0 %v2256_v53  ;;  %975 = vmatpush1.bf16.msra.mxu1 %v2256_v53 }
  0xb8   :  { %933 = vmatprep.subr.bf16.mxu0 %v2261_v54  ;;  %976 = vmatprep.subr.bf16.mxu1 %v2261_v54 }
  0xbb   :  { %934 = vmatpush1.bf16.msra.mxu0 %v2259_v55  ;;  %977 = vmatpush1.bf16.msra.mxu1 %v2259_v55 }
  0xbc   :  { %935 = vmatprep.subr.bf16.mxu0 %v2264_v56  ;;  %978 = vmatprep.subr.bf16.mxu1 %v2264_v56 }
  0xbf   :  { %936 = vmatpush1.bf16.msra.mxu0 %v2262_v57  ;;  %979 = vmatpush1.bf16.msra.mxu1 %v2262_v57  ;;  %v2302_v57 = vld [vmem:[%s2837_s3 + $0x138] sm:$0xff]  }
  0xc0   :  { %1958 = vmatprep.subr.bf16.mxu0 %v2265_v60  ;;  %1980 = vmatprep.subr.bf16.mxu1 %v2283_v61  ;;  %v2305_v60 = vld [vmem:[%s2837_s3 + $0x168] sm:$0xff]  }
  0xc1   :  { %v2306_v61 = vld [vmem:[%s2837_s3 + $0x128] sm:$0xff]  }
  0xc2   :  { %954 = vmatmul.mubr.bf16.vlgmr.msra.gmra.mxu0 %v1792_v62  ;;  %997 = vmatmul.mubr.bf16.vlgmr.msra.gmra.mxu1 %v1809_v63  ;;  %v2307_v62 = vld [vmem:[%s2837_s3 + $0x160] sm:$0xff]  }
  0xc3   :  { %1959 = vmatpush3.bf16.msra.mxu0 %v2266_v0  ;;  %1981 = vmatpush3.bf16.msra.mxu1 %v2284_v1  ;;  %v2308_v63 = vld [vmem:[%s2837_s3 + $0x120] sm:$0xff]   ;;  %v2309_v0 = vld [vmem:[%s2837_s3 + $0x158] sm:$0xff]  }
  0xc4   :  { %1960 = vmatprep.subr.bf16.mxu0 %v2267_v2  ;;  %1982 = vmatprep.subr.bf16.mxu1 %v2285_v3  ;;  %v2310_v1 = vld [vmem:[%s2837_s3 + $0x118] sm:$0xff]  }
  0xc7   :  { %1961 = vmatpush3.bf16.msra.mxu0 %v2268_v4  ;;  %1983 = vmatpush3.bf16.msra.mxu1 %v2286_v5  ;;  %v2311_v4 = vld [vmem:[%s2837_s3 + $0x150] sm:$0xff]  }
  0xc8   :  { %1962 = vmatprep.subr.bf16.mxu0 %v2269_v6  ;;  %1984 = vmatprep.subr.bf16.mxu1 %v2287_v7 }
  0xcb   :  { %1963 = vmatpush3.bf16.msra.mxu0 %v2270_v8  ;;  %1985 = vmatpush3.bf16.msra.mxu1 %v2288_v9  ;;  %v2312_v9 = vld [vmem:[%s2837_s3 + $0x110] sm:$0xff]  }
  0xcc   :  { %1964 = vmatprep.subr.bf16.mxu0 %v2271_v10  ;;  %1986 = vmatprep.subr.bf16.mxu1 %v2289_v11 }
  0xcf   :  { %1965 = vmatpush3.bf16.msra.mxu0 %v2272_v12  ;;  %1987 = vmatpush3.bf16.msra.mxu1 %v2290_v13  ;;  %v2313_v12 = vld [vmem:[%s2837_s3 + $0x148] sm:$0xff]  }
  0xd0   :  { %1966 = vmatprep.subr.bf16.mxu0 %v2273_v14  ;;  %1988 = vmatprep.subr.bf16.mxu1 %v2291_v15 }
  0xd3   :  { %1967 = vmatpush3.bf16.msra.mxu0 %v2274_v16  ;;  %1989 = vmatpush3.bf16.msra.mxu1 %v2292_v17  ;;  %v2314_v16 = vld [vmem:[%s2837_s3 + $0x108] sm:$0xff]   ;;  %v2315_v17 = vld [vmem:[%s2837_s3 + $0x140] sm:$0xff]  }
  0xd4   :  { %1968 = vmatprep.subr.bf16.mxu0 %v2275_v18  ;;  %1990 = vmatprep.subr.bf16.mxu1 %v2293_v19  ;;  %v2316_v18 = vld [vmem:[%s2837_s3 + $0x100] sm:$0xff]  }
  0xd7   :  { %1969 = vmatpush3.bf16.msra.mxu0 %v2276_v20  ;;  %1991 = vmatpush3.bf16.msra.mxu1 %v2294_v21 }
  0xd8   :  { %1970 = vmatprep.subr.bf16.mxu0 %v2277_v22  ;;  %1992 = vmatprep.subr.bf16.mxu1 %v2295_v23 }
  0xdb   :  { %1971 = vmatpush3.bf16.msra.mxu0 %v2278_v24  ;;  %1993 = vmatpush3.bf16.msra.mxu1 %v2296_v25 }
  0xdc   :  { %1972 = vmatprep.subr.bf16.mxu0 %v2279_v26  ;;  %1994 = vmatprep.subr.bf16.mxu1 %v2297_v27 }
  0xdf   :  { %1973 = vmatpush3.bf16.msra.mxu0 %v2280_v28  ;;  %1995 = vmatpush3.bf16.msra.mxu1 %v2298_v29 }
  0xe0   :  { %2002 = vmatprep.subr.bf16.mxu0 %v2301_v30  ;;  %2024 = vmatprep.subr.bf16.mxu1 %v2317_v42 }
  0xe2   :  { %v120_v31 = vpop.f32.mrf.mxu0  ;;  %v162_v32 = vpop.f32.mrf.mxu1 }
  0xe3   :  { %v168_v33 = vmax.f32 %v120_v31, %v162_v32 }
  0xe4   :  { %v2064_v34 = vpop.f32.mrf.mxu0  ;;  %v2084_v35 = vpop.f32.mrf.mxu1 }
  0xe5   :  { %v169_v36 = vmax.f32 %v168_v33, 0.0  ;;  %v2318_v33 = vld [vmem:[%s2837_s3 + $0x1b8] sm:$0xff]   ;;  %v2319_v34 = vld [vmem:[%s2837_s3 + $0x1f0] sm:$0xff]  }
  0xe6   :  { %v123_v37 = vpop.f32.mrf.mxu0  ;;  %v165_v38 = vpop.f32.mrf.mxu1  ;;  %v2320_v35 = vld [vmem:[%s2837_s3 + $0x1b0] sm:$0xff]  }
  0xe7   :  { %v170_v39 = vpack.c.bf16 %v169_v36, %v169_v36  ;;  %v2321_v36 = vld [vmem:[%s2837_s3 + $0x1e8] sm:$0xff]   ;;  %v2323_v38 = vld [vmem:[%s2837_s3 + $0x1e0] sm:$0xff]  }
  0xe8   :  { %v2065_v40 = vpop.f32.mrf.mxu0  ;;  %v2085_v41 = vpop.f32.mrf.mxu1  ;;  %v2322_v37 = vld [vmem:[%s2837_s3 + $0x1a8] sm:$0xff]  }
  0xe9   :  { %171 = vst [vmem:[#allocation2] sm:$0xf] %v170_v39  ;;  %v2324_v39 = vld [vmem:[%s2837_s3 + $0x1a0] sm:$0xff]   ;;  %v2325_v40 = vld [vmem:[%s2837_s3 + $0x1d8] sm:$0xff]  }
  0xea   :  { %v2326_v41 = vld [vmem:[%s2837_s3 + $0x198] sm:$0xff]  }
 0x102   :  { %v272_v43 = vpop.f32.mrf.mxu0  ;;  %v314_v44 = vpop.f32.mrf.mxu1 }
 0x103   :  { %v320_v45 = vmax.f32 %v272_v43, %v314_v44  ;;  %v2327_v44 = vld [vmem:[%s2837_s3 + $0x1d0] sm:$0xff]  }
 0x104   :  { %v2104_v46 = vpop.f32.mrf.mxu0  ;;  %v2124_v47 = vpop.f32.mrf.mxu1 }
 0x105   :  { %v321_v48 = vmax.f32 %v320_v45, 0.0 }
 0x106   :  { %v275_v49 = vpop.f32.mrf.mxu0  ;;  %v317_v50 = vpop.f32.mrf.mxu1 }
 0x107   :  { %v322_v51 = vpack.c.bf16 %v321_v48, %v321_v48  ;;  %v2328_v50 = vld [vmem:[%s2837_s3 + $0x190] sm:$0xff]  }
 0x108   :  { %v2105_v52 = vpop.f32.mrf.mxu0  ;;  %v2125_v53 = vpop.f32.mrf.mxu1 }
 0x109   :  { %323 = vst [vmem:[#allocation2 + $0x4] sm:$0xf] %v322_v51  ;;  %v2329_v53 = vld [vmem:[%s2837_s3 + $0x1c8] sm:$0xff]  }
 0x110   :  { %v1018_v54 = vld [vmem:[#allocation2] sm:$0xff] }
 0x111   :  { %v1812_v55 = vcombine.low %v1018_v54, %v1018_v54  ;;  %v1813_v56 = vcombine.high %v1018_v54, %v1018_v54 }
 0x113   :  { %1601 = vmatprep.mubr.bf16.mxu0 %v1813_v56 }
 0x114   :  { %1602 = vmatmul.mubr.bf16.vlgmr.msra.gmra.mxu0 %v1812_v55 }
 0x115   :  { %2003 = vmatpush3.bf16.msra.mxu0 %v2302_v57  ;;  %v2330_v57 = vld [vmem:[%s2837_s3 + $0x188] sm:$0xff]  }
 0x116   :  { %2004 = vmatprep.subr.bf16.mxu0 %v2303_v58  ;;  %v2331_v58 = vld [vmem:[%s2837_s3 + $0x1c0] sm:$0xff]  }
 0x119   :  { %2005 = vmatpush3.bf16.msra.mxu0 %v2304_v59 }
 0x11a   :  { %2006 = vmatprep.subr.bf16.mxu0 %v2305_v60 }
 0x11d   :  { %2007 = vmatpush3.bf16.msra.mxu0 %v2306_v61  ;;  %v2332_v61 = vld [vmem:[%s2837_s3 + $0x180] sm:$0xff]  }
 0x11e   :  { %2008 = vmatprep.subr.bf16.mxu0 %v2307_v62 }
 0x121   :  { %2009 = vmatpush3.bf16.msra.mxu0 %v2308_v63 }
 0x122   :  { %v424_v2 = vpop.f32.mrf.mxu0  ;;  %v466_v3 = vpop.f32.mrf.mxu1  ;;  %2010 = vmatprep.subr.bf16.mxu0 %v2309_v0 }
 0x123   :  { %v472_v5 = vmax.f32 %v424_v2, %v466_v3 }
 0x124   :  { %v2144_v6 = vpop.f32.mrf.mxu0  ;;  %v2164_v7 = vpop.f32.mrf.mxu1 }
 0x125   :  { %v473_v8 = vmax.f32 %v472_v5, 0.0  ;;  %2011 = vmatpush3.bf16.msra.mxu0 %v2310_v1 }
 0x126   :  { %v427_v10 = vpop.f32.mrf.mxu0  ;;  %v469_v11 = vpop.f32.mrf.mxu1  ;;  %2012 = vmatprep.subr.bf16.mxu0 %v2311_v4 }
 0x127   :  { %v474_v13 = vpack.c.bf16 %v473_v8, %v473_v8 }
 0x128   :  { %v2145_v14 = vpop.f32.mrf.mxu0  ;;  %v2165_v15 = vpop.f32.mrf.mxu1 }
 0x129   :  { %475 = vst [vmem:[#allocation2 + $0x8] sm:$0xf] %v474_v13  ;;  %2013 = vmatpush3.bf16.msra.mxu0 %v2312_v9 }
 0x12a   :  { %2014 = vmatprep.subr.bf16.mxu0 %v2313_v12 }
 0x12d   :  { %2015 = vmatpush3.bf16.msra.mxu0 %v2314_v16 }
 0x12e   :  { %2016 = vmatprep.subr.bf16.mxu0 %v2315_v17 }
 0x131   :  { %2017 = vmatpush3.bf16.msra.mxu0 %v2316_v18 }
 0x142   :  { %v576_v19 = vpop.f32.mrf.mxu0  ;;  %v618_v20 = vpop.f32.mrf.mxu1 }
 0x143   :  { %v624_v21 = vmax.f32 %v576_v19, %v618_v20 }
 0x144   :  { %v2184_v22 = vpop.f32.mrf.mxu0  ;;  %v2204_v23 = vpop.f32.mrf.mxu1 }
 0x145   :  { %v625_v24 = vmax.f32 %v624_v21, 0.0 }
 0x146   :  { %v579_v25 = vpop.f32.mrf.mxu0  ;;  %v621_v26 = vpop.f32.mrf.mxu1 }
 0x147   :  { %v626_v27 = vpack.c.bf16 %v625_v24, %v625_v24  ;;  %v1811_v25 = vld [vmem:[%s2838_s4] ss:$0 sm:$0xff] }
 0x148   :  { %v2185_v28 = vpop.f32.mrf.mxu0  ;;  %v2205_v29 = vpop.f32.mrf.mxu1 }
 0x149   :  { %627 = vst [vmem:[#allocation2 + $0xc] sm:$0xf] %v626_v27 }
 0x150   :  { %v1019_v30 = vld [vmem:[#allocation2 + $0x8] sm:$0xff] }
 0x151   :  { %v1814_v31 = vcombine.low %v1019_v30, %v1019_v30  ;;  %v1815_v32 = vcombine.high %v1019_v30, %v1019_v30 }
 0x153   :  { %1641 = vmatprep.mubr.bf16.mxu1 %v1815_v32 }
 0x154   :  { %1642 = vmatmul.mubr.bf16.vlgmr.msra.gmra.mxu1 %v1814_v31 }
 0x155   :  { %2025 = vmatpush3.bf16.msra.mxu1 %v2318_v33 }
 0x156   :  { %2026 = vmatprep.subr.bf16.mxu1 %v2319_v34 }
 0x159   :  { %2027 = vmatpush3.bf16.msra.mxu1 %v2320_v35 }
 0x15a   :  { %2028 = vmatprep.subr.bf16.mxu1 %v2321_v36 }
 0x15d   :  { %2029 = vmatpush3.bf16.msra.mxu1 %v2322_v37 }
 0x15e   :  { %2030 = vmatprep.subr.bf16.mxu1 %v2323_v38 }
 0x161   :  { %2031 = vmatpush3.bf16.msra.mxu1 %v2324_v39 }
 0x162   :  { %v760_v42 = vpop.f32.mrf.mxu0  ;;  %v803_v43 = vpop.f32.mrf.mxu1  ;;  %2032 = vmatprep.subr.bf16.mxu1 %v2325_v40 }
 0x163   :  { %v810_v45 = vmax.f32 %v760_v42, %v803_v43 }
 0x164   :  { %v762_v46 = vpop.f32.mrf.mxu0  ;;  %v805_v47 = vpop.f32.mrf.mxu1 }
 0x165   :  { %v812_v48 = vmax.f32 %v810_v45, 0.0  ;;  %v811_v49 = vmax.f32 %v762_v46, %v805_v47  ;;  %2033 = vmatpush3.bf16.msra.mxu1 %v2326_v41 }
 0x166   :  { %v764_v51 = vpop.f32.mrf.mxu0  ;;  %v807_v52 = vpop.f32.mrf.mxu1  ;;  %2034 = vmatprep.subr.bf16.mxu1 %v2327_v44 }
 0x167   :  { %v813_v54 = vmax.f32 %v811_v49, 0.0  ;;  %v2333_v59 = vpack.c.bf16 %v812_v48, %v812_v48 }
 0x168   :  { %v765_v55 = vpop.f32.mrf.mxu0  ;;  %v808_v56 = vpop.f32.mrf.mxu1 }
 0x169   :  { %2035 = vmatpush3.bf16.msra.mxu1 %v2328_v50  ;;  %v2334_v60 = vpack.c.bf16 %v813_v54, %v813_v54 }
 0x16a   :  { %2036 = vmatprep.subr.bf16.mxu1 %v2329_v53 }
 0x16b   :  { %1681 = vmatprep.mubr.bf16.mxu0 %v2334_v60 }
 0x16c   :  { %1682 = vmatmul.mubr.bf16.vlgmr.msra.gmra.mxu0 %v2333_v59 }
 0x16d   :  { %2037 = vmatpush3.bf16.msra.mxu1 %v2330_v57 }
 0x16e   :  { %2038 = vmatprep.subr.bf16.mxu1 %v2331_v58 }
 0x171   :  { %2039 = vmatpush3.bf16.msra.mxu1 %v2332_v61 }
 0x182   :  { %v955_v62 = vpop.f32.mrf.mxu0  ;;  %v998_v63 = vpop.f32.mrf.mxu1 }
 0x183   :  { %v1005_v0 = vmax.f32 %v955_v62, %v998_v63 }
 0x184   :  { %v957_v1 = vpop.f32.mrf.mxu0  ;;  %v1000_v2 = vpop.f32.mrf.mxu1 }
 0x185   :  { %v1006_v3 = vmax.f32 %v957_v1, %v1000_v2  ;;  %v1007_v6 = vmax.f32 %v1005_v0, 0.0 }
 0x186   :  { %v959_v4 = vpop.f32.mrf.mxu0  ;;  %v1002_v5 = vpop.f32.mrf.mxu1 }
 0x187   :  { %v1008_v7 = vmax.f32 %v1006_v3, 0.0  ;;  %v2335_v10 = vpack.c.bf16 %v1007_v6, %v1007_v6 }
 0x188   :  { %v960_v8 = vpop.f32.mrf.mxu0  ;;  %v1003_v9 = vpop.f32.mrf.mxu1 }
 0x189   :  { %v2336_v11 = vpack.c.bf16 %v1008_v7, %v1008_v7 }
 0x18b   :  { %1721 = vmatprep.mubr.bf16.mxu1 %v2336_v11 }
 0x18c   :  { %1722 = vmatmul.mubr.bf16.vlgmr.msra.gmra.mxu1 %v2335_v10 }
 0x1d4   :  { %v1974_v12 = vpop.f32.mrf.mxu0 }
 0x1d6   :  { %v1975_v13 = vpop.f32.mrf.mxu0 }
 0x1d7   :  { %v1976_v14 = vadd.f32 %v1975_v13, %v1974_v12 }
 0x1d8   :  { %v1977_v15 = vpop.f32.mrf.mxu0 }
 0x1d9   :  { %v1604_v27 = vadd.f32 %v1976_v14, %v1811_v25 }
 0x1da   :  { %v1978_v16 = vpop.f32.mrf.mxu0 }
 0x214   :  { %v1996_v17 = vpop.f32.mrf.mxu1 }
 0x216   :  { %v1997_v18 = vpop.f32.mrf.mxu1 }
 0x217   :  { %v1998_v26 = vadd.f32 %v1997_v18, %v1996_v17 }
 0x218   :  { %v1999_v19 = vpop.f32.mrf.mxu1 }
 0x219   :  { %v1644_v30 = vadd.f32 %v1998_v26, %v1604_v27 }
 0x21a   :  { %v2000_v20 = vpop.f32.mrf.mxu1 }
 0x22c   :  { %v2018_v21 = vpop.f32.mrf.mxu0 }
 0x22e   :  { %v2019_v22 = vpop.f32.mrf.mxu0 }
 0x22f   :  { %v2020_v28 = vadd.f32 %v2019_v22, %v2018_v21 }
 0x230   :  { %v2021_v23 = vpop.f32.mrf.mxu0 }
 0x231   :  { %v1684_v32 = vadd.f32 %v2020_v28, %v1644_v30 }
 0x232   :  { %v2022_v24 = vpop.f32.mrf.mxu0 }
 0x24c   :  { %v2040_v29 = vpop.f32.mrf.mxu1 }
 0x24e   :  { %v2041_v31 = vpop.f32.mrf.mxu1 }
 0x24f   :  { %v2042_v33 = vadd.f32 %v2041_v31, %v2040_v29 }
 0x250   :  { %v2043_v34 = vpop.f32.mrf.mxu1 }
 0x251   :  { %v1724_v35 = vadd.f32 %v2042_v33, %v1684_v32 }
 0x252   :  { %v2044_v36 = vpop.f32.mrf.mxu1 }
 0x253   :  { %1729 = vst [vmem:[%s2839_s5] sm:$0xff] %v1724_v35 }

</bundles_post_ra>
